<compile_context>
chip_gen: v6e
topology: v6e:2x2x1
jax: 0.10.0
libtpu: 0.0.40
codegen_flags: <defaults>
</compile_context>

<pallas_src>
import jax
import jax.numpy as jnp
from jax import lax
from jax.experimental import pallas as pl
from jax.experimental.pallas import tpu as pltpu


def _round_up(n, m):
    return pl.cdiv(n, m) * m


def linear_kernel(x_ref, w_ref, b_ref, o_ref, acc_ref):
    # x_ref: (TM, TK)  w_ref: (TN, TK)  b_ref: (1, TN)
    # o_ref: (TM, TN)  acc_ref: (TM, TN) f32 scratch
    k = pl.program_id(2)

    @pl.when(k == 0)
    def _():
        # Fold the bias add into the accumulator init (broadcast over rows).
        acc_ref[...] = jnp.broadcast_to(
            b_ref[...].astype(jnp.float32), acc_ref.shape)

    # Contract on D (last dim of both operands)  =>  x @ W^T, on the MXU.
    acc_ref[...] += lax.dot_general(
        x_ref[...], w_ref[...],
        dimension_numbers=(((1,), (1,)), ((), ())),
        preferred_element_type=jnp.float32)

    @pl.when(k == pl.num_programs(2) - 1)
    def _():
        o_ref[...] = acc_ref[...].astype(o_ref.dtype)


def linear_classifier_forward(x, weight, bias, *, tm=None, tn=128, tk=None):
    """x: [B, D] f32, weight: [C, D] f32 (PyTorch layout), bias: [C] f32."""
    B, D = x.shape
    C = weight.shape[0]

    # Adaptive tile sizes: keep (8,128) alignment, avoid gross over-padding
    # for tiny batches / feature dims while still using big tiles for large
    # problems.
    if tm is None:
        tm = min(128, _round_up(B, 8))
    if tk is None:
        tk = min(512, _round_up(D, 128))
    tn = max(128, tn)

    # Pad every dimension to its tile multiple: keeps the output lane-dense
    # (C -> multiple of 128), the MXU tiles aligned, and the (8,128) BlockSpec
    # rule satisfied. Zero padding is exact: padded D rows/cols contribute 0
    # to the contraction, padded B/C rows/cols are sliced off below.
    Bp = _round_up(B, tm)
    Cp = _round_up(C, tn)
    Dp = _round_up(D, tk)

    if (Bp, Dp) != (B, D):
        x_p = jnp.zeros((Bp, Dp), x.dtype).at[:B, :D].set(x)
    else:
        x_p = x
    if (Cp, Dp) != (C, D):
        w_p = jnp.zeros((Cp, Dp), weight.dtype).at[:C, :D].set(weight)
    else:
        w_p = weight
    if Cp != C:
        b_p = jnp.zeros((Cp,), bias.dtype).at[:C].set(bias)
    else:
        b_p = bias
    b_p = b_p.reshape(1, Cp)

    grid = (Bp // tm, Cp // tn, Dp // tk)

    out_p = pl.pallas_call(
        linear_kernel,
        out_shape=jax.ShapeDtypeStruct((Bp, Cp), x.dtype),
        grid_spec=pltpu.PrefetchScalarGridSpec(
            num_scalar_prefetch=0,
            grid=grid,
            in_specs=[
                # x tile depends on (batch, reduction) only.
                pl.BlockSpec((tm, tk), lambda i, j, k: (i, k)),
                # weight kept in [C, D] layout; tile depends on (class, reduction).
                pl.BlockSpec((tn, tk), lambda i, j, k: (j, k)),
                # bias tile indexed by class axis only.
                pl.BlockSpec((1, tn), lambda i, j, k: (0, j)),
            ],
            out_specs=pl.BlockSpec((tm, tn), lambda i, j, k: (i, j)),
            scratch_shapes=[pltpu.VMEM((tm, tn), jnp.float32)],
        ),
        compiler_params=pltpu.CompilerParams(
            dimension_semantics=("parallel", "parallel", "arbitrary")),
    )(x_p, w_p, b_p)

    return out_p[:B, :C]


if __name__ == "__main__":
    # Small shapes consistent with the module: a flattened image -> classes.
    batch = 8
    input_dim = 256
    num_classes = 2  # cats vs dogs

    key = jax.random.PRNGKey(0)
    kx, kw, kb = jax.random.split(key, 3)

    # Deterministic parameter init (PyTorch Linear default: U(-1/sqrt(D), 1/sqrt(D)))
    bound = 1.0 / (input_dim ** 0.5)
    weight = jax.random.uniform(kw, (num_classes, input_dim),
                                jnp.float32, -bound, bound)
    bias = jax.random.uniform(kb, (num_classes,), jnp.float32, -bound, bound)

    # Input: the module receives a numpy float array; here a deterministic one.
    x = jax.random.normal(kx, (batch, input_dim), jnp.float32)

    out = linear_classifier_forward(x, weight, bias)
    out = jax.block_until_ready(out)

    # Reference check in plain JAX.
    ref = x @ weight.T + bias
    assert out.shape == (batch, num_classes)
    assert jnp.allclose(out, ref, atol=1e-5, rtol=1e-5)

    print("KERNEL_OK")
</pallas_src>

<mosaic_0001>
module attributes {stable_mosaic.version = 11 : i64} {
  func.func @linear_kernel(%arg0: i32, %arg1: i32, %arg2: i32, %arg3: memref<8x256xf32, #tpu.memory_space<vmem>>, %arg4: memref<128x256xf32, #tpu.memory_space<vmem>>, %arg5: memref<1x128xf32, #tpu.memory_space<vmem>>, %arg6: memref<8x128xf32, #tpu.memory_space<vmem>>, %arg7: memref<8x128xf32, #tpu.memory_space<vmem>>) attributes {dimension_semantics = [#tpu.dimension_semantics<parallel>, #tpu.dimension_semantics<parallel>, #tpu.dimension_semantics<arbitrary>], iteration_bounds = array<i64: 1, 1, 1>, scalar_prefetch = 0 : i64, scratch_operands = 1 : i64, tpu.core_type = #tpu.core_type<tc>, window_params = [{transform_indices = @transform_0, window_bounds = array<i64: 8, 256>}, {transform_indices = @transform_1, window_bounds = array<i64: 128, 256>}, {transform_indices = @transform_2, window_bounds = array<i64: 1, 128>}, {transform_indices = @transform_3, window_bounds = array<i64: 8, 128>}]} {
    %c0_i32 = arith.constant 0 : i32
    %0 = arith.cmpi eq, %arg2, %c0_i32 : i32
    %1 = arith.extui %0 : i1 to i32
    %c0_i32_0 = arith.constant 0 : i32
    %2 = arith.cmpi ne, %1, %c0_i32_0 : i32
    scf.if %2 {
      %c0_10 = arith.constant 0 : index
      %c0_11 = arith.constant 0 : index
      %12 = vector.load %arg5[%c0_10, %c0_11] : memref<1x128xf32, #tpu.memory_space<vmem>>, vector<1x128xf32>
      %13 = vector.shape_cast %12 : vector<1x128xf32> to vector<1x128xf32>
      %14 = vector.broadcast %13 : vector<1x128xf32> to vector<8x128xf32>
      %c0_12 = arith.constant 0 : index
      %c0_13 = arith.constant 0 : index
      %15 = vector.load %arg7[%c0_12, %c0_13] : memref<8x128xf32, #tpu.memory_space<vmem>>, vector<8x128xf32>
      tpu.vector_store %arg7[%c0_12, %c0_13], %14 {strides = array<i32>} : memref<8x128xf32, #tpu.memory_space<vmem>>, vector<8x128xf32>,
    } else {
    }
    %c0 = arith.constant 0 : index
    %c0_1 = arith.constant 0 : index
    %3 = vector.load %arg7[%c0, %c0_1] : memref<8x128xf32, #tpu.memory_space<vmem>>, vector<8x128xf32>
    %c0_2 = arith.constant 0 : index
    %c0_3 = arith.constant 0 : index
    %4 = vector.load %arg3[%c0_2, %c0_3] : memref<8x256xf32, #tpu.memory_space<vmem>>, vector<8x256xf32>
    %c0_4 = arith.constant 0 : index
    %c0_5 = arith.constant 0 : index
    %5 = vector.load %arg4[%c0_4, %c0_5] : memref<128x256xf32, #tpu.memory_space<vmem>>, vector<128x256xf32>
    %cst = arith.constant dense<0.000000e+00> : vector<8x128xf32>
    %6 = tpu.matmul %4, %5, %cst {dimension_numbers = #tpu.dot_dimension_numbers<[1], [1], [0], [0], [0, 0, 1, 0], [], []>} : vector<8x256xf32>, vector<128x256xf32>, vector<8x128xf32> -> vector<8x128xf32>
    %7 = arith.addf %3, %6 : vector<8x128xf32>
    %c0_6 = arith.constant 0 : index
    %c0_7 = arith.constant 0 : index
    %8 = vector.load %arg7[%c0_6, %c0_7] : memref<8x128xf32, #tpu.memory_space<vmem>>, vector<8x128xf32>
    tpu.vector_store %arg7[%c0_6, %c0_7], %7 {strides = array<i32>} : memref<8x128xf32, #tpu.memory_space<vmem>>, vector<8x128xf32>,
    %c0_i32_8 = arith.constant 0 : i32
    %9 = arith.cmpi eq, %arg2, %c0_i32_8 : i32
    %10 = arith.extui %9 : i1 to i32
    %c0_i32_9 = arith.constant 0 : i32
    %11 = arith.cmpi ne, %10, %c0_i32_9 : i32
    scf.if %11 {
      %c0_10 = arith.constant 0 : index
      %c0_11 = arith.constant 0 : index
      %12 = vector.load %arg7[%c0_10, %c0_11] : memref<8x128xf32, #tpu.memory_space<vmem>>, vector<8x128xf32>
      %c0_12 = arith.constant 0 : index
      %c0_13 = arith.constant 0 : index
      %13 = vector.load %arg6[%c0_12, %c0_13] : memref<8x128xf32, #tpu.memory_space<vmem>>, vector<8x128xf32>
      tpu.vector_store %arg6[%c0_12, %c0_13], %12 {strides = array<i32>} : memref<8x128xf32, #tpu.memory_space<vmem>>, vector<8x128xf32>,
    } else {
    }
    return
  }
  func.func @transform_0(%arg0: i32, %arg1: i32, %arg2: i32) -> (i32, i32) {
    %c0_i32 = arith.constant 0 : i32
    return %arg0, %arg2 : i32, i32
  }
  func.func @transform_1(%arg0: i32, %arg1: i32, %arg2: i32) -> (i32, i32) {
    %c0_i32 = arith.constant 0 : i32
    return %arg1, %arg2 : i32, i32
  }
  func.func @transform_2(%arg0: i32, %arg1: i32, %arg2: i32) -> (i32, i32) {
    %c0_i32 = arith.constant 0 : i32
    %c0_i32_0 = arith.constant 0 : i32
    return %c0_i32, %arg1 : i32, i32
  }
  func.func @transform_3(%arg0: i32, %arg1: i32, %arg2: i32) -> (i32, i32) {
    %c0_i32 = arith.constant 0 : i32
    return %arg0, %arg1 : i32, i32
  }
}

</mosaic_0001>

<bundles_post_ra>
// kernel: tpu_custom_call.1
= control target key start
LH: loop header
LB: loop body
LE: loop exit
PB: predicated region body
PF: predicated region fallthrough
CT: control target
= control target key end

     0   :  { %8 = vsyncpa [#allocation4], 0  ;;  %s290_s0 = inlined_call_operand.hbm [shape: f32[8,256], index: 0, kind: input, shape index: {}]   ;;  %s291_s1 = inlined_call_operand.hbm [shape: f32[128,256], index: 1, kind: input, shape index: {}]   ;;  %s292_s2 = inlined_call_operand.vmem [shape: f32[1,128], index: 2, kind: input, shape index: {}]   ;;  %s293_s3 = inlined_call_operand.hbm [shape: f32[8,128], index: 3, kind: output, shape index: {}]  }
   0x1   :  { %9 = vsyncpa [#allocation7], 0 }
   0x2   :  { %10 = vsyncpa [#allocation5], 0  ;;  %s253_s12 = smov [#allocation3]   ;;  %s254_s14 = smov [#allocation6]  }
   0x3   :  { %s17_s13 = sshll.u32 %s253_s12, 4  ;;  %s26_s15 = sshll.u32 %s254_s14, 4  ;;  %s18_s13 = int_to_ptr.vmem [resolvable:$true] %s17_s13  ;;  %s27_s15 = int_to_ptr.vmem [resolvable:$true] %s26_s15 }
   0x4   :  { %s195_s16 = scalar_lea.vmem %s18_s13, 256  ;;  %p200_p1 = scmp.lt.s32.totalorder %s18_s13, %s18_s13 }
   0x5   :  { %p196_p0 = scmp.ne.s32.totalorder %s18_s13, %s195_s16  ;;  %p201_p2 = scmp.lt.s32.totalorder %s195_s16, %s195_s16 }
   0x7   :  { %p202_p3 = por %p201_p2, %p200_p1 }
   0x9   :  { %p203_p4 = pnand %p202_p3, %p196_p0 }
   0xb   :  { %206 = shalt.err (!%p203_p4)
}
   0xc   :  { %20 = dma.hbm_to_vmem [thread:$0]  %s290_s0, 256, %s18_s13, [#allocation4]  }
   0xd   :  { %s215_s19 = scalar_lea.vmem %s27_s15, 4096  ;;  %p220_p6 = scmp.lt.s32.totalorder %s27_s15, %s27_s15 }
   0xe   :  { %p216_p5 = scmp.ne.s32.totalorder %s27_s15, %s215_s19  ;;  %p221_p7 = scmp.lt.s32.totalorder %s215_s19, %s215_s19 }
  0x10   :  { %p222_p8 = por %p221_p7, %p220_p6 }
  0x12   :  { %p223_p9 = pnand %p222_p8, %p216_p5 }
  0x14   :  { %226 = shalt.err (!%p223_p9)
}
  0x15   :  { %s255_s20 = smov 256   ;;  %s256_s21 = smov 16  }
  0x16   :  { %32 = dma.hbm_to_vmem [thread:$0]  %s291_s1, 4096, %s27_s15, [#allocation7], %s255_s20, %s255_s20, %s256_s21  }
  0x17   :  { %247 = dma.done.wait [#allocation4], 256  }
  0x18   :  { %248 = vsyncadd [#allocation4], 4294967040 }
  0x19   :  { %249 = dma.done.wait [#allocation7], 4096  }
  0x1a   :  { %250 = vsyncadd [#allocation7], 4294963200  ;;  %v87_v0 = vld [vmem:[#allocation6 + $0xf8] sm:$0xff]  ;;  %v86_v1 = vld [vmem:[#allocation6 + $0xf0] sm:$0xff]  ;;  %s257_s24 = smov [#allocation8]  }
  0x1b   :  { %v85_v2 = vld [vmem:[#allocation6 + $0xe8] sm:$0xff]  ;;  %88 = vmatprep.subr.mxu0 %v87_v0  ;;  %v84_v3 = vld [vmem:[#allocation6 + $0xe0] sm:$0xff]  ;;  %v83_v4 = vld [vmem:[#allocation6 + $0xd8] sm:$0xff]  ;;  %s171_s25 = sshll.u32 %s257_s24, 4  ;;  %s172_s25 = int_to_ptr.vmem [resolvable:$true] %s171_s25 }
  0x1c   :  { %89 = vmatpush1.xpose.msra.mxu0 %v86_v1  ;;  %v82_v5 = vld [vmem:[#allocation6 + $0xd0] sm:$0xff]  ;;  %v81_v6 = vld [vmem:[#allocation6 + $0xc8] sm:$0xff]  ;;  %v55_v7 = vld [vmem:[#allocation3 + $0x8] sm:$0xff]  ;;  %s227_s26 = scalar_lea.vmem %s172_s25, 128  ;;  %p232_p11 = scmp.lt.s32.totalorder %s172_s25, %s172_s25 }
  0x1d   :  { %90 = vmatprep.subr.mxu0 %v85_v2  ;;  %v80_v8 = vld [vmem:[#allocation6 + $0xc0] sm:$0xff]  ;;  %152 = vmatprep.mubr.f32.mxu0 %v55_v7  ;;  %v79_v9 = vld [vmem:[#allocation6 + $0xb8] sm:$0xff]  ;;  %v78_v10 = vld [vmem:[#allocation6 + $0xb0] sm:$0xff]  ;;  %p228_p10 = scmp.ne.s32.totalorder %s172_s25, %s227_s26  ;;  %p233_p12 = scmp.lt.s32.totalorder %s227_s26, %s227_s26 }
  0x1e   :  { %v77_v11 = vld [vmem:[#allocation6 + $0xa8] sm:$0xff]  ;;  %v76_v12 = vld [vmem:[#allocation6 + $0xa0] sm:$0xff]  ;;  %v75_v13 = vld [vmem:[#allocation6 + $0x98] sm:$0xff] }
  0x1f   :  { %v74_v14 = vld [vmem:[#allocation6 + $0x90] sm:$0xff]  ;;  %v73_v15 = vld [vmem:[#allocation6 + $0x88] sm:$0xff]  ;;  %v72_v16 = vld [vmem:[#allocation6 + $0x80] sm:$0xff]  ;;  %p234_p13 = por %p233_p12, %p232_p11 }
  0x20   :  { %91 = vmatpush1.xpose.msra.mxu0 %v84_v3  ;;  %v71_v17 = vld [vmem:[#allocation6 + $0x78] sm:$0xff]  ;;  %v70_v18 = vld [vmem:[#allocation6 + $0x70] sm:$0xff]  ;;  %v69_v19 = vld [vmem:[#allocation6 + $0x68] sm:$0xff] }
  0x21   :  { %92 = vmatprep.subr.mxu0 %v83_v4  ;;  %v68_v20 = vld [vmem:[#allocation6 + $0x60] sm:$0xff]  ;;  %v67_v21 = vld [vmem:[#allocation6 + $0x58] sm:$0xff]  ;;  %v66_v22 = vld [vmem:[#allocation6 + $0x50] sm:$0xff]  ;;  %p235_p0 = pnand %p234_p13, %p228_p10 }
  0x22   :  { %v65_v23 = vld [vmem:[#allocation6 + $0x48] sm:$0xff]  ;;  %v64_v24 = vld [vmem:[#allocation6 + $0x40] sm:$0xff]  ;;  %v63_v25 = vld [vmem:[#allocation6 + $0x38] sm:$0xff] }
  0x23   :  { %v62_v26 = vld [vmem:[#allocation6 + $0x30] sm:$0xff]  ;;  %v61_v27 = vld [vmem:[#allocation6 + $0x28] sm:$0xff]  ;;  %v60_v28 = vld [vmem:[#allocation6 + $0x20] sm:$0xff] }
  0x24   :  { %93 = vmatpush1.xpose.msra.mxu0 %v82_v5  ;;  %v59_v29 = vld [vmem:[#allocation6 + $0x18] sm:$0xff]  ;;  %v58_v30 = vld [vmem:[#allocation6 + $0x10] sm:$0xff]  ;;  %v57_v31 = vld [vmem:[#allocation6 + $0x8] sm:$0xff] }
  0x25   :  { %94 = vmatprep.subr.mxu0 %v81_v6  ;;  %v56_v32 = vld [vmem:[#allocation6] sm:$0xff]  ;;  %v54_v33 = vld [vmem:[#allocation3] sm:$0xff] }
  0x26   :  { %v181_v34 = vld [vmem:[%s292_s2] ss:$0 sm:$0xff] }
  0x28   :  { %95 = vmatpush1.xpose.msra.mxu0 %v80_v8 }
  0x29   :  { %96 = vmatprep.subr.mxu0 %v79_v9 }
  0x2c   :  { %97 = vmatpush1.xpose.msra.mxu0 %v78_v10 }
  0x2d   :  { %98 = vmatprep.subr.mxu0 %v77_v11 }
  0x30   :  { %99 = vmatpush1.xpose.msra.mxu0 %v76_v12 }
  0x31   :  { %100 = vmatprep.subr.mxu0 %v75_v13 }
  0x34   :  { %101 = vmatpush1.xpose.msra.mxu0 %v74_v14 }
  0x35   :  { %102 = vmatprep.subr.mxu0 %v73_v15 }
  0x38   :  { %103 = vmatpush1.xpose.msra.mxu0 %v72_v16 }
  0x39   :  { %104 = vmatprep.subr.mxu0 %v71_v17 }
  0x3c   :  { %105 = vmatpush1.xpose.msra.mxu0 %v70_v18 }
  0x3d   :  { %106 = vmatprep.subr.mxu0 %v69_v19 }
  0x40   :  { %107 = vmatpush1.xpose.msra.mxu0 %v68_v20 }
  0x41   :  { %108 = vmatprep.subr.mxu0 %v67_v21 }
  0x44   :  { %109 = vmatpush1.xpose.msra.mxu0 %v66_v22 }
  0x45   :  { %110 = vmatprep.subr.mxu0 %v65_v23 }
  0x48   :  { %111 = vmatpush1.xpose.msra.mxu0 %v64_v24 }
  0x49   :  { %112 = vmatprep.subr.mxu0 %v63_v25 }
  0x4c   :  { %113 = vmatpush1.xpose.msra.mxu0 %v62_v26 }
  0x4d   :  { %114 = vmatprep.subr.mxu0 %v61_v27 }
  0x50   :  { %115 = vmatpush1.xpose.msra.mxu0 %v60_v28 }
  0x51   :  { %116 = vmatprep.subr.mxu0 %v59_v29 }
  0x54   :  { %117 = vmatpush1.xpose.msra.mxu0 %v58_v30 }
  0x55   :  { %118 = vmatprep.subr.mxu0 %v57_v31 }
  0x58   :  { %119 = vmatpush1.xpose.msra.mxu0 %v56_v32 }
  0x5b   :  { %153 = vmatmul.mubr.f32.vlgmr.msra.gmra.mxu0 %v54_v33 }
 0x11b   :  { %v154_v35 = vpop.f32.mrf.mxu0 }
 0x11c   :  { %v158_v36 = vadd.f32 %v181_v34, %v154_v35 }
 0x11d   :  { %v156_v37 = vpop.f32.mrf.mxu0 }
 0x11e   :  { %164 = vst [vmem:[#allocation8] sm:$0xff] %v158_v36 }
 0x11f   :  { %238 = shalt.err (!%p235_p0)
}
 0x120   :  { %174 = dma.vmem_to_hbm [thread:$0]  %s172_s25, 128, %s293_s3, [#allocation5]  }
 0x121   :  { %251 = dma.done.wait [#allocation5], 128  }
 0x122   :  { %252 = vsyncadd [#allocation5], 4294967168 }
 0x123   :  { %178 = vsyncpa [#allocation4], 1 }
 0x124   :  { %179 = vsyncpa [#allocation7], 1 }
 0x125   :  { %180 = vsyncpa [#allocation5], 1 }

</bundles_post_ra>
